<compile_context>
chip_gen: v7x
topology: tpu7x:2x2x1
jax: 0.10.0
libtpu: 0.0.40
codegen_flags: <defaults>
</compile_context>

<pallas_src>
import jax
import jax.numpy as jnp
from jax import lax
from jax.experimental import pallas as pl
from jax.experimental.pallas import tpu as pltpu


def unet_up_kernel(x_ref, w_ref, out_ref):
    # x_ref:   (1, C_in, L)        bf16
    # w_ref:   (4*C_pad, C_in)     bf16  (tap k occupies rows [k*C_pad, k*C_pad+C_out))
    # out_ref: (1, 2, C_out, L)    f32   (plane 0 = even output times, plane 1 = odd)
    x = x_ref[0]                               # (C_in, L)
    L = x.shape[-1]
    c_pad = w_ref.shape[0] // 4
    c_out = out_ref.shape[2]

    # --- one fused MXU pass over all four taps (bf16 in, f32 accumulate) ---
    p = jnp.dot(w_ref[...], x, preferred_element_type=jnp.float32)   # (4*C_pad, L)
    p0 = p[0 * c_pad:0 * c_pad + c_out, :]     # W0^T x
    p1 = p[1 * c_pad:1 * c_pad + c_out, :]     # W1^T x
    p2 = p[2 * c_pad:2 * c_pad + c_out, :]     # W2^T x
    p3 = p[3 * c_pad:3 * c_pad + c_out, :]     # W3^T x

    # ConvTranspose1d(k=4, s=2, p=1):
    #   y[:, 2j]   = W1^T x[:, j] + W3^T x[:, j-1]
    #   y[:, 2j+1] = W2^T x[:, j] + W0^T x[:, j+1]
    # Shift the small RESULT planes on the XLU; only the wrapped boundary column
    # needs zeroing (single (1, L) lane mask, broadcast over channels).
    lane = lax.broadcasted_iota(jnp.int32, (1, L), 1)
    even = p1 + jnp.where(lane == 0, 0.0, pltpu.roll(p3, shift=1, axis=1))
    odd = p2 + jnp.where(lane == L - 1, 0.0, pltpu.roll(p0, shift=L - 1, axis=1))

    # --- InstanceNorm1d over the full length 2L (biased var, eps=1e-5, no affine) ---
    # Exact two-pass stats (mean, then centered variance) to avoid cancellation.
    denom = jnp.float32(2 * L)
    mean = (jnp.sum(even, axis=1, keepdims=True)
            + jnp.sum(odd, axis=1, keepdims=True)) / denom           # (C_out, 1)
    ec = even - mean
    oc = odd - mean
    var = (jnp.sum(ec * ec, axis=1, keepdims=True)
           + jnp.sum(oc * oc, axis=1, keepdims=True)) / denom
    inv = lax.rsqrt(var + jnp.float32(1e-5))

    # ReLU + dense lane-wide stores (last dim = L lanes).
    out_ref[0, 0] = jnp.maximum(ec * inv, 0.0)
    out_ref[0, 1] = jnp.maximum(oc * inv, 0.0)


def unet_up_forward(x, w, skip):
    """x: (N, C_in, L); w: (C_in, C_out, 4) [PyTorch ConvTranspose1d layout];
    skip: (N, C_skip, L_skip). Returns (N, C_out + C_skip, L_skip)."""
    N, c_in, L = x.shape
    c_out = w.shape[1]
    c_pad = ((c_out + 7) // 8) * 8            # 8-align each tap's row block

    # Pack all 4 pre-transposed taps into ONE (4*C_pad, C_in) bf16 weight.
    w_t = jnp.transpose(w, (2, 1, 0))                                  # (4, C_out, C_in)
    w_t = jnp.pad(w_t, ((0, 0), (0, c_pad - c_out), (0, 0)))           # (4, C_pad, C_in)
    w_all = w_t.reshape(4 * c_pad, c_in).astype(jnp.bfloat16)

    xb = x.astype(jnp.bfloat16)

    planes = pl.pallas_call(
        unet_up_kernel,
        out_shape=jax.ShapeDtypeStruct((N, 2, c_out, L), jnp.float32),
        grid_spec=pltpu.PrefetchScalarGridSpec(
            num_scalar_prefetch=0,
            grid=(N,),
            in_specs=[pl.BlockSpec((1, c_in, L), lambda n: (n, 0, 0)),
                      pl.BlockSpec((4 * c_pad, c_in), lambda n: (0, 0))],
            out_specs=pl.BlockSpec((1, 2, c_out, L), lambda n: (n, 0, 0, 0))),
        compiler_params=pltpu.CompilerParams(
            dimension_semantics=("parallel",),          # batch -> both TCs on v7x
            vmem_limit_bytes=32 * 1024 * 1024),
    )(xb, w_all)

    # Epilogue: one XLA pass (under jit the transpose/pad/concat fuse into a
    # single output write). The even/odd lane interleave is pure data movement.
    y = jnp.transpose(planes, (0, 2, 3, 1)).reshape(N, c_out, 2 * L)
    if y.shape[-1] != skip.shape[-1]:                   # F.pad(x, (0, 1)) branch
        y = jnp.pad(y, ((0, 0), (0, 0), (0, 1)))
    return jnp.concatenate([y, skip], axis=1)

    # TODO(synk): nn.Dropout is inactive in the reference module (dropout=0.0) and
    #             is not implemented here.


def unet_up_reference(x, w, skip):
    """Pure-JAX reference (scatter-add ConvTranspose1d). Uses the same bf16
    rounding of x / w as the kernel so the comparison stays tight; the conv is
    computed as an exact f32 broadcast-sum (no MXU)."""
    N, c_in, L = x.shape
    c_out = w.shape[1]
    xb = x.astype(jnp.bfloat16).astype(jnp.float32)
    wb = w.astype(jnp.bfloat16).astype(jnp.float32)
    ypad = jnp.zeros((N, c_out, 2 * L + 3), jnp.float32)
    for k in range(4):
        # ck[n, o, i] = sum_c xb[n, c, i] * wb[c, o, k]
        ck = jnp.sum(xb[:, :, None, :] * wb[None, :, :, k, None], axis=1)
        ypad = ypad.at[:, :, k:k + 2 * L:2].add(ck)
    y = ypad[:, :, 1:2 * L + 1]
    mean = y.mean(axis=-1, keepdims=True)
    var = y.var(axis=-1, keepdims=True)      # biased, like InstanceNorm1d
    y = jnp.maximum((y - mean) / jnp.sqrt(var + 1e-5), 0.0)
    if y.shape[-1] != skip.shape[-1]:
        y = jnp.pad(y, ((0, 0), (0, 0), (0, 1)))
    return jnp.concatenate([y, skip], axis=1)


if __name__ == "__main__":
    # Small shapes consistent with the module: the transposed conv doubles the
    # length and the UNet skip has out_size channels at the doubled length.
    N, in_size, out_size, L = 2, 8, 4, 16

    key = jax.random.PRNGKey(0)
    kx, kw, ks = jax.random.split(key, 3)
    x = jax.random.normal(kx, (N, in_size, L), dtype=jnp.float32)
    w = jax.random.normal(kw, (in_size, out_size, 4), dtype=jnp.float32) * 0.1
    skip = jax.random.normal(ks, (N, out_size, 2 * L), dtype=jnp.float32)

    fwd = jax.jit(unet_up_forward)
    out = jax.block_until_ready(fwd(x, w, skip))

    ref = unet_up_reference(x, w, skip)
    assert out.shape == (N, 2 * out_size, 2 * L), out.shape
    max_err = float(jnp.max(jnp.abs(out - ref)))
    # bf16 matmul inputs (f32 accumulation) -> comfortably inside 1e-3 on O(1) outputs.
    assert max_err < 1e-3, max_err

    print("KERNEL_OK")
</pallas_src>

<mosaic_0001>
module attributes {stable_mosaic.version = 11 : i64} {
  func.func @unet_up_kernel(%arg0: i32, %arg1: memref<1x8x16xbf16, #tpu.memory_space<vmem>>, %arg2: memref<32x8xbf16, #tpu.memory_space<vmem>>, %arg3: memref<1x2x4x16xf32, #tpu.memory_space<vmem>>) attributes {dimension_semantics = [#tpu.dimension_semantics<parallel>], iteration_bounds = array<i64: 2>, scalar_prefetch = 0 : i64, scratch_operands = 0 : i64, tpu.core_type = #tpu.core_type<tc>, window_params = [{transform_indices = @transform_0, window_bounds = array<i64: 1, 8, 16>}, {pipeline_mode = #tpu.pipeline_mode<synchronous>, transform_indices = @transform_1, window_bounds = array<i64: 32, 8>}, {transform_indices = @transform_2, window_bounds = array<i64: 1, 2, 4, 16>}]} {
    %c0 = arith.constant 0 : index
    %c0_0 = arith.constant 0 : index
    %c0_1 = arith.constant 0 : index
    %0 = vector.load %arg1[%c0, %c0_0, %c0_1] : memref<1x8x16xbf16, #tpu.memory_space<vmem>>, vector<1x8x16xbf16>
    %1 = vector.shape_cast %0 : vector<1x8x16xbf16> to vector<8x16xbf16>
    %c0_2 = arith.constant 0 : index
    %c0_3 = arith.constant 0 : index
    %2 = vector.load %arg2[%c0_2, %c0_3] : memref<32x8xbf16, #tpu.memory_space<vmem>>, vector<32x8xbf16>
    %cst = arith.constant dense<0.000000e+00> : vector<32x16xf32>
    %3 = tpu.matmul %2, %1, %cst {dimension_numbers = #tpu.dot_dimension_numbers<[1], [0], [0], [1], [0, 0, 1, 1], [], []>} : vector<32x8xbf16>, vector<8x16xbf16>, vector<32x16xf32> -> vector<32x16xf32>
    %4 = vector.extract_strided_slice %3 {offsets = [0, 0], sizes = [4, 16], strides = [1, 1]} : vector<32x16xf32> to vector<4x16xf32>
    %5 = vector.extract_strided_slice %3 {offsets = [8, 0], sizes = [4, 16], strides = [1, 1]} : vector<32x16xf32> to vector<4x16xf32>
    %6 = vector.extract_strided_slice %3 {offsets = [16, 0], sizes = [4, 16], strides = [1, 1]} : vector<32x16xf32> to vector<4x16xf32>
    %7 = vector.extract_strided_slice %3 {offsets = [24, 0], sizes = [4, 16], strides = [1, 1]} : vector<32x16xf32> to vector<4x16xf32>
    %8 = tpu.iota {dimensions = array<i32: 1>} : vector<1x16xi32>
    %c0_i32 = arith.constant 0 : i32
    %9 = vector.broadcast %c0_i32 : i32 to vector<1x16xi32>
    %10 = arith.cmpi eq, %8, %9 : vector<1x16xi32>
    %c1_i32 = arith.constant 1 : i32
    %11 = tpu.dynamic_rotate %7 by %c1_i32 dim 1 : vector<4x16xf32>, i32 -> vector<4x16xf32>
    %cst_4 = arith.constant 0.000000e+00 : f32
    %12 = vector.shape_cast %10 : vector<1x16xi1> to vector<1x16xi1>
    %13 = vector.broadcast %12 : vector<1x16xi1> to vector<4x16xi1>
    %14 = vector.broadcast %cst_4 : f32 to vector<4x16xf32>
    %15 = arith.select %13, %14, %11 : vector<4x16xi1>, vector<4x16xf32>
    %16 = arith.addf %5, %15 : vector<4x16xf32>
    %c15_i32 = arith.constant 15 : i32
    %17 = vector.broadcast %c15_i32 : i32 to vector<1x16xi32>
    %18 = arith.cmpi eq, %8, %17 : vector<1x16xi32>
    %c15_i32_5 = arith.constant 15 : i32
    %19 = tpu.dynamic_rotate %4 by %c15_i32_5 dim 1 : vector<4x16xf32>, i32 -> vector<4x16xf32>
    %cst_6 = arith.constant 0.000000e+00 : f32
    %20 = vector.shape_cast %18 : vector<1x16xi1> to vector<1x16xi1>
    %21 = vector.broadcast %20 : vector<1x16xi1> to vector<4x16xi1>
    %22 = vector.broadcast %cst_6 : f32 to vector<4x16xf32>
    %23 = arith.select %21, %22, %19 : vector<4x16xi1>, vector<4x16xf32>
    %24 = arith.addf %6, %23 : vector<4x16xf32>
    %cst_7 = arith.constant dense<0.000000e+00> : vector<4xf32>
    %25 = vector.multi_reduction <add>, %16, %cst_7 [1] : vector<4x16xf32> to vector<4xf32>
    %26 = vector.shape_cast %25 : vector<4xf32> to vector<4x1xf32>
    %cst_8 = arith.constant dense<0.000000e+00> : vector<4xf32>
    %27 = vector.multi_reduction <add>, %24, %cst_8 [1] : vector<4x16xf32> to vector<4xf32>
    %28 = vector.shape_cast %27 : vector<4xf32> to vector<4x1xf32>
    %29 = arith.addf %26, %28 : vector<4x1xf32>
    %cst_9 = arith.constant 3.200000e+01 : f32
    %30 = vector.broadcast %cst_9 : f32 to vector<4x1xf32>
    %31 = arith.divf %29, %30 : vector<4x1xf32>
    %32 = vector.broadcast %31 : vector<4x1xf32> to vector<4x16xf32>
    %33 = arith.subf %16, %32 : vector<4x16xf32>
    %34 = vector.broadcast %31 : vector<4x1xf32> to vector<4x16xf32>
    %35 = arith.subf %24, %34 : vector<4x16xf32>
    %36 = arith.mulf %33, %33 : vector<4x16xf32>
    %cst_10 = arith.constant dense<0.000000e+00> : vector<4xf32>
    %37 = vector.multi_reduction <add>, %36, %cst_10 [1] : vector<4x16xf32> to vector<4xf32>
    %38 = vector.shape_cast %37 : vector<4xf32> to vector<4x1xf32>
    %39 = arith.mulf %35, %35 : vector<4x16xf32>
    %cst_11 = arith.constant dense<0.000000e+00> : vector<4xf32>
    %40 = vector.multi_reduction <add>, %39, %cst_11 [1] : vector<4x16xf32> to vector<4xf32>
    %41 = vector.shape_cast %40 : vector<4xf32> to vector<4x1xf32>
    %42 = arith.addf %38, %41 : vector<4x1xf32>
    %cst_12 = arith.constant 3.200000e+01 : f32
    %43 = vector.broadcast %cst_12 : f32 to vector<4x1xf32>
    %44 = arith.divf %42, %43 : vector<4x1xf32>
    %cst_13 = arith.constant 9.99999974E-6 : f32
    %45 = vector.broadcast %cst_13 : f32 to vector<4x1xf32>
    %46 = arith.addf %44, %45 : vector<4x1xf32>
    %47 = math.rsqrt %46 : vector<4x1xf32>
    %48 = vector.broadcast %47 : vector<4x1xf32> to vector<4x16xf32>
    %49 = arith.mulf %33, %48 : vector<4x16xf32>
    %cst_14 = arith.constant 0.000000e+00 : f32
    %50 = vector.broadcast %cst_14 : f32 to vector<4x16xf32>
    %51 = arith.maximumf %49, %50 : vector<4x16xf32>
    %c0_15 = arith.constant 0 : index
    %c0_16 = arith.constant 0 : index
    %c0_17 = arith.constant 0 : index
    %c0_18 = arith.constant 0 : index
    %52 = vector.load %arg3[%c0_15, %c0_16, %c0_17, %c0_18] : memref<1x2x4x16xf32, #tpu.memory_space<vmem>>, vector<1x1x4x16xf32>
    %53 = vector.shape_cast %52 : vector<1x1x4x16xf32> to vector<4x16xf32>
    %54 = vector.shape_cast %51 : vector<4x16xf32> to vector<1x1x4x16xf32>
    tpu.vector_store %arg3[%c0_15, %c0_16, %c0_17, %c0_18], %54 {strides = array<i32>} : memref<1x2x4x16xf32, #tpu.memory_space<vmem>>, vector<1x1x4x16xf32>,
    %55 = vector.broadcast %47 : vector<4x1xf32> to vector<4x16xf32>
    %56 = arith.mulf %35, %55 : vector<4x16xf32>
    %cst_19 = arith.constant 0.000000e+00 : f32
    %57 = vector.broadcast %cst_19 : f32 to vector<4x16xf32>
    %58 = arith.maximumf %56, %57 : vector<4x16xf32>
    %c0_20 = arith.constant 0 : index
    %c1 = arith.constant 1 : index
    %c0_21 = arith.constant 0 : index
    %c0_22 = arith.constant 0 : index
    %59 = vector.load %arg3[%c0_20, %c1, %c0_21, %c0_22] : memref<1x2x4x16xf32, #tpu.memory_space<vmem>>, vector<1x1x4x16xf32>
    %60 = vector.shape_cast %59 : vector<1x1x4x16xf32> to vector<4x16xf32>
    %61 = vector.shape_cast %58 : vector<4x16xf32> to vector<1x1x4x16xf32>
    tpu.vector_store %arg3[%c0_20, %c1, %c0_21, %c0_22], %61 {strides = array<i32>} : memref<1x2x4x16xf32, #tpu.memory_space<vmem>>, vector<1x1x4x16xf32>,
    return
  }
  func.func @transform_0(%arg0: i32) -> (i32, i32, i32) {
    %c0_i32 = arith.constant 0 : i32
    %c0_i32_0 = arith.constant 0 : i32
    %c0_i32_1 = arith.constant 0 : i32
    return %arg0, %c0_i32, %c0_i32_0 : i32, i32, i32
  }
  func.func @transform_1(%arg0: i32) -> (i32, i32) {
    %c0_i32 = arith.constant 0 : i32
    %c0_i32_0 = arith.constant 0 : i32
    %c0_i32_1 = arith.constant 0 : i32
    return %c0_i32, %c0_i32_0 : i32, i32
  }
  func.func @transform_2(%arg0: i32) -> (i32, i32, i32, i32) {
    %c0_i32 = arith.constant 0 : i32
    %c0_i32_0 = arith.constant 0 : i32
    %c0_i32_1 = arith.constant 0 : i32
    %c0_i32_2 = arith.constant 0 : i32
    return %arg0, %c0_i32, %c0_i32_0, %c0_i32_1 : i32, i32, i32, i32
  }
}

</mosaic_0001>

<bundles_post_ra>
// kernel: unet_up_forward.1
= control target key start
LH: loop header
LB: loop body
LE: loop exit
PB: predicated region body
PF: predicated region fallthrough
CT: control target
= control target key end

     0   :  { %s403_s9 = smov 0   ;;  %s436_s0 = inlined_call_operand.vmem [shape: bf16[2,8,16], index: 0, kind: input, shape index: {}]   ;;  %s437_s1 = inlined_call_operand.vmem [shape: bf16[32,8], index: 1, kind: input, shape index: {}]   ;;  %s438_s2 = inlined_call_operand.vmem [shape: f32[2,2,4,16], index: 2, kind: output, shape index: {}]  }
   0x1 LB: > { %s336_s10 = sadd.s32 4294967295, %s383_s9   ;;  %p340_p0 = scmp.ge.s32.totalorder %s383_s9, 1  ;;  %s383_s9 = sphi %s403_s9, %s12_s9  }
   0x2   : > { %p111_p1 = scmp.lt.s32.totalorder %s383_s9, 3 }
   0x4   : > { %p112_p2 = pnand %p340_p0, %p111_p1 }
   0x5   : > { %p132_p3 = scmp.lt.s32.totalorder (!%p112_p2), %s336_s10, 1  ;;  %v373_v0 = vld [vmem:[%s437_s1] sm:$0xff] (!%p112_p2)   ;;  %vm157_vm0 = vcmask (!%p112_p2), 64512   ;;  %vm164_vm1 = vcmask (!%p112_p2), 1043456   ;;  %v374_v3 = vld [vmem:[%s437_s1 + $0x8] sm:$0xff] (!%p112_p2)   ;;  %s385_s19 = smov (!%p112_p2), 16   ;;  %v217_v16 = vlaneseq (!%p112_p2) }
   0x6   : > { %115 = sbr.rel (%p112_p2) target bundleno = 909 (0x38d), region = 28  ;;  %357 = vmatprep.mubr.msk.bf16.mxu0 (!%p112_p2), %vm157_vm0, %v373_v0  ;;  %vm220_vm2 = vcmask (!%p112_p2), 1047680   ;;  %s386_s20 = smov (!%p112_p2), 113   ;;  %vm250_vm4 = vcmask (!%p112_p2), 125952  }
   0x7   : > { %s387_s21 = smov (!%p112_p2), 127   ;;  %v218_v17 = vand.u32 (!%p112_p2), 127, %v217_v16 }
   0x9   : > { %vm219_vm3 = vcmp.eq.s32.totalorder (!%p112_p2), %v218_v17, 0  ;;  %vm235_vm5 = vcmp.eq.s32.totalorder (!%p112_p2), %v218_v17, 15 }
   0xd   : > { %s440_s10 = smov (!%p132_p3, %s336_s10), 1 }
   0xe   : > { %s341_s13 = sshll.u32 %s440_s10, 2  ;;  %s351_s22 = sshll.u32 %s440_s10, 3 }
   0xf   : > { %s135_s16 = scalar_lea.vmem %s436_s0, %s341_s13  ;;  %s140_s25 = scalar_lea.vmem %s438_s2, %s351_s22 }
  0x10   : > { %v142_v1 = vld [vmem:[%s135_s16] sm:$0xf] }
  0x11   : > { %361 = vmatprep.subr.msk.bf16.mxu0 %vm164_vm1, %v142_v1  ;;  %v166_v2 = vsel %vm164_vm1, %v142_v1, 0 }
  0x12   : > { %356 = vmatpush3.bf16.msra.mxu0 %v166_v2 }
  0x15   : > { %358 = vmatmul.mubr.msk.bf16.vlgmr.msra.gmra.mrb[0].mxu0 %vm157_vm0, %v374_v3 }
  0xe8   : > { %v359_v4 = vpop.f32.mrb[0].mxu0 }
  0xe9   : > { %v202_v5 = vpop.f32.mrb[1].mxu0 }
  0xea   : > { %v360_v6 = vpop.f32.mrb[2].mxu0 }
  0xeb   : > { %221 = vrot.lane.b32.xlu0 %v360_v6, %s385_s19  ;;  %v205_v7 = vpop.f32.mrb[3].mxu0 }
  0xef   : > { %236 = vrot.lane.b32.xlu0 %v202_v5, %s385_s19 }
 0x15d   : > { %v222_v8 = vpop.permute.xlu0 %221 }
 0x15e   : > { %v223_v9 = vsel %vm220_vm2, %v222_v8, %v360_v6 }
 0x15f   : > { %224 = vrot.lane.b32.xlu1 %v223_v9, %s385_s19 }
 0x161   : > { %v237_v10 = vpop.permute.xlu0 %236 }
 0x162   : > { %v238_v11 = vsel %vm220_vm2, %v237_v10, %v202_v5 }
 0x163   : > { %239 = vrot.lane.b32.xlu1 %v238_v11, %s385_s19 }
 0x1d1   : > { %v225_v12 = vpop.permute.xlu1 %224 }
 0x1d2   : > { %v226_v13 = vsel %vm220_vm2, %v225_v12, %v360_v6 }
 0x1d3   : > { %230 = vrot.lane.b32.xlu0 %v226_v13, %s386_s20 }
 0x1d5   : > { %v240_v14 = vpop.permute.xlu1 %239 }
 0x1d6   : > { %v241_v15 = vsel %vm220_vm2, %v240_v14, %v202_v5 }
 0x1d7   : > { %245 = vrot.lane.b32.xlu1 %v241_v15, %s387_s21 }
 0x245   : > { %v231_v18 = vpop.permute.xlu0 %230 }
 0x246   : > { %v233_v19 = vsel %vm219_vm3, 0.0, %v231_v18 }
 0x247   : > { %v234_v20 = vadd.f32 %v233_v19, %v205_v7 }
 0x249   : > { %v246_v21 = vpop.permute.xlu1 %245  ;;  %v251_v22 = vsel %vm250_vm4, %v234_v20, 0.0 }
 0x24a   : > { %v248_v23 = vsel %vm235_vm5, 0.0, %v246_v21  ;;  %252 = vadd.xlane.f32.xlu0 %v251_v22 }
 0x24b   : > { %v249_v24 = vadd.f32 %v359_v4, %v248_v23 }
 0x24d   : > { %v254_v25 = vsel %vm250_vm4, %v249_v24, 0.0 }
 0x24e   : > { %255 = vadd.xlane.f32.xlu1 %v254_v25 }
 0x2d7   : > { %v253_v26 = vpop.xlane.xlu0 %252 }
 0x2db   : > { %v256_v27 = vpop.xlane.xlu1 %255 }
 0x2dc   : > { %v257_v28 = vadd.f32 %v256_v27, %v253_v26 }
 0x2de   : > { %v259_v29 = vmul.f32 0.03125, %v257_v28 }
 0x2e0   : > { %v260_v30 = vsub.f32 %v234_v20, %v259_v29  ;;  %v261_v31 = vsub.f32 %v249_v24, %v259_v29 }
 0x2e2   : > { %v262_v32 = vmul.f32 %v260_v30, %v260_v30  ;;  %v266_v34 = vmul.f32 %v261_v31, %v261_v31 }
 0x2e4   : > { %v263_v33 = vsel %vm250_vm4, %v262_v32, 0.0  ;;  %v267_v35 = vsel %vm250_vm4, %v266_v34, 0.0 }
 0x2e5   : > { %264 = vadd.xlane.f32.xlu0 %v263_v33 }
 0x2e9   : > { %268 = vadd.xlane.f32.xlu0 %v267_v35 }
 0x372   : > { %v265_v36 = vpop.xlane.xlu0 %264 }
 0x376   : > { %v269_v37 = vpop.xlane.xlu0 %268 }
 0x377   : > { %v270_v38 = vadd.f32 %v269_v37, %v265_v36 }
 0x379   : > { %v271_v39 = vmul.f32 0.03125, %v270_v38 }
 0x37b   : > { %v272_v40 = vadd.f32 1e-05, %v271_v39 }
 0x37d   : > { %375 = vrsqrt.f32 %v272_v40 }
 0x387   : > { %v376_v41 = vpop.eup %375 }
 0x388   : > { %v274_v42 = vmul.f32 %v376_v41, %v260_v30  ;;  %v277_v43 = vmul.f32 %v376_v41, %v261_v31 }
 0x38a   : > { %v275_v44 = vmax.f32 %v274_v42, 0.0  ;;  %v278_v45 = vmax.f32 %v277_v43, 0.0 }
 0x38c   : > { %276 = vst.msk [vmem:[%s140_s25] sm:$0xf] %vm250_vm4, %v275_v44  ;;  %348 = vst.msk [vmem:[%s140_s25 + $0x4] sm:$0xf] %vm250_vm4, %v278_v45 }
 0x38d PF: > { %s12_s9 = sadd.s32 1, %s383_s9  }
 0x38e   : > { %p9_p4 = scmp.ge.s32.totalorder %s12_s9, 4  }
 0x390   :  { %11 = sbr.rel (!%p9_p4) target bundleno = 1 (0x1), region = 59 }

</bundles_post_ra>
